<compile_context>
chip_gen: v7x
topology: tpu7x:2x2x1
jax: 0.10.0
libtpu: 0.0.40
codegen_flags: <defaults>
</compile_context>

<pallas_src>
import numpy as np
import jax
import jax.numpy as jnp
from jax.experimental import pallas as pl
from jax.experimental.pallas import tpu as pltpu


def _fold_bn(w, gamma, beta, mean, var, eps):
    """Fold eval-mode BatchNorm into a bias-free conv: returns (w_folded, bias)."""
    scale = gamma / jnp.sqrt(var + eps)                       # (Co,)
    w_f = (w * scale[:, None, None, None]).astype(jnp.float32)
    b_f = (beta - mean * scale).astype(jnp.float32)
    return w_f, b_f


def _make_double_conv_kernel(H, W):
    HW = H * W

    def _conv3x3_bn_relu(inp, w_ref, b_ref, mask_ref):
        # inp:      (Ci, HW) float32 value
        # w_ref:    (9, Co, Ci) folded weights, tap k = (dy+1)*3 + (dx+1)
        # b_ref:    (Co, 1) folded BN bias
        # mask_ref: (9, 1, HW) 0/1 boundary masks (zero-padding semantics)
        c_out = w_ref.shape[1]
        acc = jnp.zeros((c_out, HW), jnp.float32)
        k = 0
        for dy in (-1, 0, 1):
            for dx in (-1, 0, 1):
                if dy == 0 and dx == 0:
                    tap = inp                                  # no shift, full mask
                else:
                    # tap[p] = inp[p + dy*W + dx]  (wrapped lanes killed by mask)
                    shift = (-(dy * W + dx)) % HW
                    tap = pltpu.roll(inp, shift=shift, axis=1) * mask_ref[k]
                acc = acc + jnp.dot(w_ref[k], tap,
                                    preferred_element_type=jnp.float32)
                k += 1
        return jnp.maximum(acc + b_ref[...], 0.0)              # bias + ReLU

    def kernel(x_ref, w1_ref, b1_ref, w2_ref, b2_ref, mask_ref, o_ref):
        x = x_ref[...].astype(jnp.float32)                     # (Cin, HW)
        h = _conv3x3_bn_relu(x, w1_ref, b1_ref, mask_ref)      # (Cmid, HW)  stays on-chip
        y = _conv3x3_bn_relu(h, w2_ref, b2_ref, mask_ref)      # (Cout, HW)
        o_ref[...] = y.astype(o_ref.dtype)

    return kernel


def double_conv(x, w1, bn1, w2, bn2, eps=1e-5):
    """DoubleConv forward.

    x:   (N, Cin, H, W)  NCHW
    w1:  (Cmid, Cin, 3, 3)   w2: (Cout, Cmid, 3, 3)   (conv weights, no bias)
    bn1, bn2: tuples (gamma, beta, running_mean, running_var) for eval-mode BN.
    """
    N, Cin, H, W = x.shape
    Cmid = w1.shape[0]
    Cout = w2.shape[0]
    HW = H * W

    w1f, b1f = _fold_bn(w1, *bn1, eps)
    w2f, b2f = _fold_bn(w2, *bn2, eps)

    # (Co, Ci, 3, 3) -> (9, Co, Ci); tap index k = ky*3 + kx = (dy+1)*3 + (dx+1)
    w1k = jnp.transpose(w1f, (2, 3, 0, 1)).reshape(9, Cmid, Cin)
    w2k = jnp.transpose(w2f, (2, 3, 0, 1)).reshape(9, Cout, Cmid)
    b1k = b1f.reshape(Cmid, 1)
    b2k = b2f.reshape(Cout, 1)

    # 0/1 boundary masks over the flattened H*W lane axis (compile-time constant).
    hh, ww = np.meshgrid(np.arange(H), np.arange(W), indexing="ij")
    masks = []
    for dy in (-1, 0, 1):
        for dx in (-1, 0, 1):
            m = ((hh + dy >= 0) & (hh + dy < H) & (ww + dx >= 0) & (ww + dx < W))
            masks.append(m.reshape(1, HW))
    mask = jnp.asarray(np.stack(masks), dtype=jnp.float32)     # (9, 1, HW)

    x2 = x.reshape(N, Cin, HW)        # free reshape — no transpose / pad passes

    kernel = _make_double_conv_kernel(H, W)

    out = pl.pallas_call(
        kernel,
        out_shape=jax.ShapeDtypeStruct((N, Cout, HW), x.dtype),
        grid_spec=pltpu.PrefetchScalarGridSpec(
            num_scalar_prefetch=0,
            grid=(N,),
            in_specs=[
                pl.BlockSpec((None, Cin, HW), lambda n: (n, 0, 0)),
                pl.BlockSpec((9, Cmid, Cin), lambda n: (0, 0, 0)),
                pl.BlockSpec((Cmid, 1), lambda n: (0, 0)),
                pl.BlockSpec((9, Cout, Cmid), lambda n: (0, 0, 0)),
                pl.BlockSpec((Cout, 1), lambda n: (0, 0)),
                pl.BlockSpec((9, 1, HW), lambda n: (0, 0, 0)),
            ],
            out_specs=pl.BlockSpec((None, Cout, HW), lambda n: (n, 0, 0)),
        ),
        compiler_params=pltpu.CompilerParams(
            dimension_semantics=("parallel",)),
    )(x2, w1k, b1k, w2k, b2k, mask)

    return out.reshape(N, Cout, H, W)


if __name__ == "__main__":
    key = jax.random.PRNGKey(0)
    ks = jax.random.split(key, 11)

    N, Cin, Cout, H, W = 2, 4, 8, 16, 16
    Cmid = Cout                      # DoubleConv default: mid_channels = out_channels
    eps = 1e-5

    x = jax.random.normal(ks[0], (N, Cin, H, W), jnp.float32)

    def conv_init(k, co, ci):
        bound = 1.0 / np.sqrt(ci * 9)
        return jax.random.uniform(k, (co, ci, 3, 3), jnp.float32, -bound, bound)

    w1 = conv_init(ks[1], Cmid, Cin)
    w2 = conv_init(ks[2], Cout, Cmid)
    bn1 = (1.0 + 0.1 * jax.random.normal(ks[3], (Cmid,), jnp.float32),   # gamma
           0.1 * jax.random.normal(ks[4], (Cmid,), jnp.float32),         # beta
           0.1 * jax.random.normal(ks[5], (Cmid,), jnp.float32),         # running_mean
           0.5 + jax.random.uniform(ks[6], (Cmid,), jnp.float32))        # running_var
    bn2 = (1.0 + 0.1 * jax.random.normal(ks[7], (Cout,), jnp.float32),
           0.1 * jax.random.normal(ks[8], (Cout,), jnp.float32),
           0.1 * jax.random.normal(ks[9], (Cout,), jnp.float32),
           0.5 + jax.random.uniform(ks[10], (Cout,), jnp.float32))

    y = jax.jit(double_conv)(x, w1, bn1, w2, bn2)
    y = jax.block_until_ready(y)

    # Pure-JAX reference: Conv2d(3x3, pad=1, no bias) -> BatchNorm2d(eval) -> ReLU, twice.
    def ref_block(inp, w, bn):
        g, b, m, v = bn
        o = jax.lax.conv_general_dilated(
            inp, w, window_strides=(1, 1), padding=((1, 1), (1, 1)),
            dimension_numbers=("NCHW", "OIHW", "NCHW"),
            precision=jax.lax.Precision.HIGHEST)
        o = (o - m[None, :, None, None]) / jnp.sqrt(v[None, :, None, None] + eps)
        o = o * g[None, :, None, None] + b[None, :, None, None]
        return jnp.maximum(o, 0.0)

    y_ref = ref_block(ref_block(x, w1, bn1), w2, bn2)

    assert y.shape == (N, Cout, H, W)
    max_err = float(jnp.max(jnp.abs(y - y_ref)))
    assert jnp.allclose(y, y_ref, atol=5e-3, rtol=5e-3), f"max_abs_err={max_err}"
    print("KERNEL_OK")
</pallas_src>

<mosaic_0001>
module attributes {stable_mosaic.version = 11 : i64} {
  func.func @kernel(%arg0: i32, %arg1: memref<1x4x256xf32, #tpu.memory_space<vmem>>, %arg2: memref<9x8x4xf32, #tpu.memory_space<vmem>>, %arg3: memref<8x1xf32, #tpu.memory_space<vmem>>, %arg4: memref<9x8x8xf32, #tpu.memory_space<vmem>>, %arg5: memref<8x1xf32, #tpu.memory_space<vmem>>, %arg6: memref<9x1x256xf32, #tpu.memory_space<vmem>>, %arg7: memref<1x8x256xf32, #tpu.memory_space<vmem>>) attributes {dimension_semantics = [#tpu.dimension_semantics<parallel>], iteration_bounds = array<i64: 2>, scalar_prefetch = 0 : i64, scratch_operands = 0 : i64, tpu.core_type = #tpu.core_type<tc>, window_params = [{transform_indices = @transform_0, window_bounds = array<i64: 1, 4, 256>}, {pipeline_mode = #tpu.pipeline_mode<synchronous>, transform_indices = @transform_1, window_bounds = array<i64: 9, 8, 4>}, {pipeline_mode = #tpu.pipeline_mode<synchronous>, transform_indices = @transform_2, window_bounds = array<i64: 8, 1>}, {pipeline_mode = #tpu.pipeline_mode<synchronous>, transform_indices = @transform_3, window_bounds = array<i64: 9, 8, 8>}, {pipeline_mode = #tpu.pipeline_mode<synchronous>, transform_indices = @transform_4, window_bounds = array<i64: 8, 1>}, {pipeline_mode = #tpu.pipeline_mode<synchronous>, transform_indices = @transform_5, window_bounds = array<i64: 9, 1, 256>}, {transform_indices = @transform_6, window_bounds = array<i64: 1, 8, 256>}]} {
    %c0 = arith.constant 0 : index
    %c0_0 = arith.constant 0 : index
    %c0_1 = arith.constant 0 : index
    %0 = vector.load %arg1[%c0, %c0_0, %c0_1] : memref<1x4x256xf32, #tpu.memory_space<vmem>>, vector<1x4x256xf32>
    %1 = vector.shape_cast %0 : vector<1x4x256xf32> to vector<4x256xf32>
    %cst = arith.constant 0.000000e+00 : f32
    %2 = vector.broadcast %cst : f32 to vector<8x256xf32>
    %c17_i32 = arith.constant 17 : i32
    %3 = tpu.dynamic_rotate %1 by %c17_i32 dim 1 : vector<4x256xf32>, i32 -> vector<4x256xf32>
    %c0_2 = arith.constant 0 : index
    %c0_3 = arith.constant 0 : index
    %c0_4 = arith.constant 0 : index
    %4 = vector.load %arg6[%c0_2, %c0_3, %c0_4] : memref<9x1x256xf32, #tpu.memory_space<vmem>>, vector<1x1x256xf32>
    %5 = vector.shape_cast %4 : vector<1x1x256xf32> to vector<1x256xf32>
    %6 = vector.broadcast %5 : vector<1x256xf32> to vector<4x256xf32>
    %7 = arith.mulf %3, %6 : vector<4x256xf32>
    %c0_5 = arith.constant 0 : index
    %c0_6 = arith.constant 0 : index
    %c0_7 = arith.constant 0 : index
    %8 = vector.load %arg2[%c0_5, %c0_6, %c0_7] : memref<9x8x4xf32, #tpu.memory_space<vmem>>, vector<1x8x4xf32>
    %9 = vector.shape_cast %8 : vector<1x8x4xf32> to vector<8x4xf32>
    %cst_8 = arith.constant dense<0.000000e+00> : vector<8x256xf32>
    %10 = tpu.matmul %9, %7, %cst_8 {dimension_numbers = #tpu.dot_dimension_numbers<[1], [0], [0], [1], [0, 0, 1, 1], [], []>} : vector<8x4xf32>, vector<4x256xf32>, vector<8x256xf32> -> vector<8x256xf32>
    %11 = arith.addf %2, %10 : vector<8x256xf32>
    %c16_i32 = arith.constant 16 : i32
    %12 = tpu.dynamic_rotate %1 by %c16_i32 dim 1 : vector<4x256xf32>, i32 -> vector<4x256xf32>
    %c1 = arith.constant 1 : index
    %c0_9 = arith.constant 0 : index
    %c0_10 = arith.constant 0 : index
    %13 = vector.load %arg6[%c1, %c0_9, %c0_10] : memref<9x1x256xf32, #tpu.memory_space<vmem>>, vector<1x1x256xf32>
    %14 = vector.shape_cast %13 : vector<1x1x256xf32> to vector<1x256xf32>
    %15 = vector.broadcast %14 : vector<1x256xf32> to vector<4x256xf32>
    %16 = arith.mulf %12, %15 : vector<4x256xf32>
    %c1_11 = arith.constant 1 : index
    %c0_12 = arith.constant 0 : index
    %c0_13 = arith.constant 0 : index
    %17 = vector.load %arg2[%c1_11, %c0_12, %c0_13] : memref<9x8x4xf32, #tpu.memory_space<vmem>>, vector<1x8x4xf32>
    %18 = vector.shape_cast %17 : vector<1x8x4xf32> to vector<8x4xf32>
    %cst_14 = arith.constant dense<0.000000e+00> : vector<8x256xf32>
    %19 = tpu.matmul %18, %16, %cst_14 {dimension_numbers = #tpu.dot_dimension_numbers<[1], [0], [0], [1], [0, 0, 1, 1], [], []>} : vector<8x4xf32>, vector<4x256xf32>, vector<8x256xf32> -> vector<8x256xf32>
    %20 = arith.addf %11, %19 : vector<8x256xf32>
    %c15_i32 = arith.constant 15 : i32
    %21 = tpu.dynamic_rotate %1 by %c15_i32 dim 1 : vector<4x256xf32>, i32 -> vector<4x256xf32>
    %c2 = arith.constant 2 : index
    %c0_15 = arith.constant 0 : index
    %c0_16 = arith.constant 0 : index
    %22 = vector.load %arg6[%c2, %c0_15, %c0_16] : memref<9x1x256xf32, #tpu.memory_space<vmem>>, vector<1x1x256xf32>
    %23 = vector.shape_cast %22 : vector<1x1x256xf32> to vector<1x256xf32>
    %24 = vector.broadcast %23 : vector<1x256xf32> to vector<4x256xf32>
    %25 = arith.mulf %21, %24 : vector<4x256xf32>
    %c2_17 = arith.constant 2 : index
    %c0_18 = arith.constant 0 : index
    %c0_19 = arith.constant 0 : index
    %26 = vector.load %arg2[%c2_17, %c0_18, %c0_19] : memref<9x8x4xf32, #tpu.memory_space<vmem>>, vector<1x8x4xf32>
    %27 = vector.shape_cast %26 : vector<1x8x4xf32> to vector<8x4xf32>
    %cst_20 = arith.constant dense<0.000000e+00> : vector<8x256xf32>
    %28 = tpu.matmul %27, %25, %cst_20 {dimension_numbers = #tpu.dot_dimension_numbers<[1], [0], [0], [1], [0, 0, 1, 1], [], []>} : vector<8x4xf32>, vector<4x256xf32>, vector<8x256xf32> -> vector<8x256xf32>
    %29 = arith.addf %20, %28 : vector<8x256xf32>
    %c1_i32 = arith.constant 1 : i32
    %30 = tpu.dynamic_rotate %1 by %c1_i32 dim 1 : vector<4x256xf32>, i32 -> vector<4x256xf32>
    %c3 = arith.constant 3 : index
    %c0_21 = arith.constant 0 : index
    %c0_22 = arith.constant 0 : index
    %31 = vector.load %arg6[%c3, %c0_21, %c0_22] : memref<9x1x256xf32, #tpu.memory_space<vmem>>, vector<1x1x256xf32>
    %32 = vector.shape_cast %31 : vector<1x1x256xf32> to vector<1x256xf32>
    %33 = vector.broadcast %32 : vector<1x256xf32> to vector<4x256xf32>
    %34 = arith.mulf %30, %33 : vector<4x256xf32>
    %c3_23 = arith.constant 3 : index
    %c0_24 = arith.constant 0 : index
    %c0_25 = arith.constant 0 : index
    %35 = vector.load %arg2[%c3_23, %c0_24, %c0_25] : memref<9x8x4xf32, #tpu.memory_space<vmem>>, vector<1x8x4xf32>
    %36 = vector.shape_cast %35 : vector<1x8x4xf32> to vector<8x4xf32>
    %cst_26 = arith.constant dense<0.000000e+00> : vector<8x256xf32>
    %37 = tpu.matmul %36, %34, %cst_26 {dimension_numbers = #tpu.dot_dimension_numbers<[1], [0], [0], [1], [0, 0, 1, 1], [], []>} : vector<8x4xf32>, vector<4x256xf32>, vector<8x256xf32> -> vector<8x256xf32>
    %38 = arith.addf %29, %37 : vector<8x256xf32>
    %c4 = arith.constant 4 : index
    %c0_27 = arith.constant 0 : index
    %c0_28 = arith.constant 0 : index
    %39 = vector.load %arg2[%c4, %c0_27, %c0_28] : memref<9x8x4xf32, #tpu.memory_space<vmem>>, vector<1x8x4xf32>
    %40 = vector.shape_cast %39 : vector<1x8x4xf32> to vector<8x4xf32>
    %cst_29 = arith.constant dense<0.000000e+00> : vector<8x256xf32>
    %41 = tpu.matmul %40, %1, %cst_29 {dimension_numbers = #tpu.dot_dimension_numbers<[1], [0], [0], [1], [0, 0, 1, 1], [], []>} : vector<8x4xf32>, vector<4x256xf32>, vector<8x256xf32> -> vector<8x256xf32>
    %42 = arith.addf %38, %41 : vector<8x256xf32>
    %c255_i32 = arith.constant 255 : i32
    %43 = tpu.dynamic_rotate %1 by %c255_i32 dim 1 : vector<4x256xf32>, i32 -> vector<4x256xf32>
    %c5 = arith.constant 5 : index
    %c0_30 = arith.constant 0 : index
    %c0_31 = arith.constant 0 : index
    %44 = vector.load %arg6[%c5, %c0_30, %c0_31] : memref<9x1x256xf32, #tpu.memory_space<vmem>>, vector<1x1x256xf32>
    %45 = vector.shape_cast %44 : vector<1x1x256xf32> to vector<1x256xf32>
    %46 = vector.broadcast %45 : vector<1x256xf32> to vector<4x256xf32>
    %47 = arith.mulf %43, %46 : vector<4x256xf32>
    %c5_32 = arith.constant 5 : index
    %c0_33 = arith.constant 0 : index
    %c0_34 = arith.constant 0 : index
    %48 = vector.load %arg2[%c5_32, %c0_33, %c0_34] : memref<9x8x4xf32, #tpu.memory_space<vmem>>, vector<1x8x4xf32>
    %49 = vector.shape_cast %48 : vector<1x8x4xf32> to vector<8x4xf32>
    %cst_35 = arith.constant dense<0.000000e+00> : vector<8x256xf32>
    %50 = tpu.matmul %49, %47, %cst_35 {dimension_numbers = #tpu.dot_dimension_numbers<[1], [0], [0], [1], [0, 0, 1, 1], [], []>} : vector<8x4xf32>, vector<4x256xf32>, vector<8x256xf32> -> vector<8x256xf32>
    %51 = arith.addf %42, %50 : vector<8x256xf32>
    %c241_i32 = arith.constant 241 : i32
    %52 = tpu.dynamic_rotate %1 by %c241_i32 dim 1 : vector<4x256xf32>, i32 -> vector<4x256xf32>
    %c6 = arith.constant 6 : index
    %c0_36 = arith.constant 0 : index
    %c0_37 = arith.constant 0 : index
    %53 = vector.load %arg6[%c6, %c0_36, %c0_37] : memref<9x1x256xf32, #tpu.memory_space<vmem>>, vector<1x1x256xf32>
    %54 = vector.shape_cast %53 : vector<1x1x256xf32> to vector<1x256xf32>
    %55 = vector.broadcast %54 : vector<1x256xf32> to vector<4x256xf32>
    %56 = arith.mulf %52, %55 : vector<4x256xf32>
    %c6_38 = arith.constant 6 : index
    %c0_39 = arith.constant 0 : index
    %c0_40 = arith.constant 0 : index
    %57 = vector.load %arg2[%c6_38, %c0_39, %c0_40] : memref<9x8x4xf32, #tpu.memory_space<vmem>>, vector<1x8x4xf32>
    %58 = vector.shape_cast %57 : vector<1x8x4xf32> to vector<8x4xf32>
    %cst_41 = arith.constant dense<0.000000e+00> : vector<8x256xf32>
    %59 = tpu.matmul %58, %56, %cst_41 {dimension_numbers = #tpu.dot_dimension_numbers<[1], [0], [0], [1], [0, 0, 1, 1], [], []>} : vector<8x4xf32>, vector<4x256xf32>, vector<8x256xf32> -> vector<8x256xf32>
    %60 = arith.addf %51, %59 : vector<8x256xf32>
    %c240_i32 = arith.constant 240 : i32
    %61 = tpu.dynamic_rotate %1 by %c240_i32 dim 1 : vector<4x256xf32>, i32 -> vector<4x256xf32>
    %c7 = arith.constant 7 : index
    %c0_42 = arith.constant 0 : index
    %c0_43 = arith.constant 0 : index
    %62 = vector.load %arg6[%c7, %c0_42, %c0_43] : memref<9x1x256xf32, #tpu.memory_space<vmem>>, vector<1x1x256xf32>
    %63 = vector.shape_cast %62 : vector<1x1x256xf32> to vector<1x256xf32>
    %64 = vector.broadcast %63 : vector<1x256xf32> to vector<4x256xf32>
    %65 = arith.mulf %61, %64 : vector<4x256xf32>
    %c7_44 = arith.constant 7 : index
    %c0_45 = arith.constant 0 : index
    %c0_46 = arith.constant 0 : index
    %66 = vector.load %arg2[%c7_44, %c0_45, %c0_46] : memref<9x8x4xf32, #tpu.memory_space<vmem>>, vector<1x8x4xf32>
    %67 = vector.shape_cast %66 : vector<1x8x4xf32> to vector<8x4xf32>
    %cst_47 = arith.constant dense<0.000000e+00> : vector<8x256xf32>
    %68 = tpu.matmul %67, %65, %cst_47 {dimension_numbers = #tpu.dot_dimension_numbers<[1], [0], [0], [1], [0, 0, 1, 1], [], []>} : vector<8x4xf32>, vector<4x256xf32>, vector<8x256xf32> -> vector<8x256xf32>
    %69 = arith.addf %60, %68 : vector<8x256xf32>
    %c239_i32 = arith.constant 239 : i32
    %70 = tpu.dynamic_rotate %1 by %c239_i32 dim 1 : vector<4x256xf32>, i32 -> vector<4x256xf32>
    %c8 = arith.constant 8 : index
    %c0_48 = arith.constant 0 : index
    %c0_49 = arith.constant 0 : index
    %71 = vector.load %arg6[%c8, %c0_48, %c0_49] : memref<9x1x256xf32, #tpu.memory_space<vmem>>, vector<1x1x256xf32>
    %72 = vector.shape_cast %71 : vector<1x1x256xf32> to vector<1x256xf32>
    %73 = vector.broadcast %72 : vector<1x256xf32> to vector<4x256xf32>
    %74 = arith.mulf %70, %73 : vector<4x256xf32>
    %c8_50 = arith.constant 8 : index
    %c0_51 = arith.constant 0 : index
    %c0_52 = arith.constant 0 : index
    %75 = vector.load %arg2[%c8_50, %c0_51, %c0_52] : memref<9x8x4xf32, #tpu.memory_space<vmem>>, vector<1x8x4xf32>
    %76 = vector.shape_cast %75 : vector<1x8x4xf32> to vector<8x4xf32>
    %cst_53 = arith.constant dense<0.000000e+00> : vector<8x256xf32>
    %77 = tpu.matmul %76, %74, %cst_53 {dimension_numbers = #tpu.dot_dimension_numbers<[1], [0], [0], [1], [0, 0, 1, 1], [], []>} : vector<8x4xf32>, vector<4x256xf32>, vector<8x256xf32> -> vector<8x256xf32>
    %78 = arith.addf %69, %77 : vector<8x256xf32>
    %c0_54 = arith.constant 0 : index
    %c0_55 = arith.constant 0 : index
    %79 = vector.load %arg3[%c0_54, %c0_55] : memref<8x1xf32, #tpu.memory_space<vmem>>, vector<8x1xf32>
    %80 = vector.broadcast %79 : vector<8x1xf32> to vector<8x256xf32>
    %81 = arith.addf %78, %80 : vector<8x256xf32>
    %cst_56 = arith.constant 0.000000e+00 : f32
    %82 = vector.broadcast %cst_56 : f32 to vector<8x256xf32>
    %83 = arith.maximumf %81, %82 : vector<8x256xf32>
    %cst_57 = arith.constant 0.000000e+00 : f32
    %84 = vector.broadcast %cst_57 : f32 to vector<8x256xf32>
    %c17_i32_58 = arith.constant 17 : i32
    %85 = tpu.dynamic_rotate %83 by %c17_i32_58 dim 1 : vector<8x256xf32>, i32 -> vector<8x256xf32>
    %c0_59 = arith.constant 0 : index
    %c0_60 = arith.constant 0 : index
    %c0_61 = arith.constant 0 : index
    %86 = vector.load %arg6[%c0_59, %c0_60, %c0_61] : memref<9x1x256xf32, #tpu.memory_space<vmem>>, vector<1x1x256xf32>
    %87 = vector.shape_cast %86 : vector<1x1x256xf32> to vector<1x256xf32>
    %88 = vector.broadcast %87 : vector<1x256xf32> to vector<8x256xf32>
    %89 = arith.mulf %85, %88 : vector<8x256xf32>
    %c0_62 = arith.constant 0 : index
    %c0_63 = arith.constant 0 : index
    %c0_64 = arith.constant 0 : index
    %90 = vector.load %arg4[%c0_62, %c0_63, %c0_64] : memref<9x8x8xf32, #tpu.memory_space<vmem>>, vector<1x8x8xf32>
    %91 = vector.shape_cast %90 : vector<1x8x8xf32> to vector<8x8xf32>
    %cst_65 = arith.constant dense<0.000000e+00> : vector<8x256xf32>
    %92 = tpu.matmul %91, %89, %cst_65 {dimension_numbers = #tpu.dot_dimension_numbers<[1], [0], [0], [1], [0, 0, 1, 1], [], []>} : vector<8x8xf32>, vector<8x256xf32>, vector<8x256xf32> -> vector<8x256xf32>
    %93 = arith.addf %84, %92 : vector<8x256xf32>
    %c16_i32_66 = arith.constant 16 : i32
    %94 = tpu.dynamic_rotate %83 by %c16_i32_66 dim 1 : vector<8x256xf32>, i32 -> vector<8x256xf32>
    %c1_67 = arith.constant 1 : index
    %c0_68 = arith.constant 0 : index
    %c0_69 = arith.constant 0 : index
    %95 = vector.load %arg6[%c1_67, %c0_68, %c0_69] : memref<9x1x256xf32, #tpu.memory_space<vmem>>, vector<1x1x256xf32>
    %96 = vector.shape_cast %95 : vector<1x1x256xf32> to vector<1x256xf32>
    %97 = vector.broadcast %96 : vector<1x256xf32> to vector<8x256xf32>
    %98 = arith.mulf %94, %97 : vector<8x256xf32>
    %c1_70 = arith.constant 1 : index
    %c0_71 = arith.constant 0 : index
    %c0_72 = arith.constant 0 : index
    %99 = vector.load %arg4[%c1_70, %c0_71, %c0_72] : memref<9x8x8xf32, #tpu.memory_space<vmem>>, vector<1x8x8xf32>
    %100 = vector.shape_cast %99 : vector<1x8x8xf32> to vector<8x8xf32>
    %cst_73 = arith.constant dense<0.000000e+00> : vector<8x256xf32>
    %101 = tpu.matmul %100, %98, %cst_73 {dimension_numbers = #tpu.dot_dimension_numbers<[1], [0], [0], [1], [0, 0, 1, 1], [], []>} : vector<8x8xf32>, vector<8x256xf32>, vector<8x256xf32> -> vector<8x256xf32>
    %102 = arith.addf %93, %101 : vector<8x256xf32>
    %c15_i32_74 = arith.constant 15 : i32
    %103 = tpu.dynamic_rotate %83 by %c15_i32_74 dim 1 : vector<8x256xf32>, i32 -> vector<8x256xf32>
    %c2_75 = arith.constant 2 : index
    %c0_76 = arith.constant 0 : index
    %c0_77 = arith.constant 0 : index
    %104 = vector.load %arg6[%c2_75, %c0_76, %c0_77] : memref<9x1x256xf32, #tpu.memory_space<vmem>>, vector<1x1x256xf32>
    %105 = vector.shape_cast %104 : vector<1x1x256xf32> to vector<1x256xf32>
    %106 = vector.broadcast %105 : vector<1x256xf32> to vector<8x256xf32>
    %107 = arith.mulf %103, %106 : vector<8x256xf32>
    %c2_78 = arith.constant 2 : index
    %c0_79 = arith.constant 0 : index
    %c0_80 = arith.constant 0 : index
    %108 = vector.load %arg4[%c2_78, %c0_79, %c0_80] : memref<9x8x8xf32, #tpu.memory_space<vmem>>, vector<1x8x8xf32>
    %109 = vector.shape_cast %108 : vector<1x8x8xf32> to vector<8x8xf32>
    %cst_81 = arith.constant dense<0.000000e+00> : vector<8x256xf32>
    %110 = tpu.matmul %109, %107, %cst_81 {dimension_numbers = #tpu.dot_dimension_numbers<[1], [0], [0], [1], [0, 0, 1, 1], [], []>} : vector<8x8xf32>, vector<8x256xf32>, vector<8x256xf32> -> vector<8x256xf32>
    %111 = arith.addf %102, %110 : vector<8x256xf32>
    %c1_i32_82 = arith.constant 1 : i32
    %112 = tpu.dynamic_rotate %83 by %c1_i32_82 dim 1 : vector<8x256xf32>, i32 -> vector<8x256xf32>
    %c3_83 = arith.constant 3 : index
    %c0_84 = arith.constant 0 : index
    %c0_85 = arith.constant 0 : index
    %113 = vector.load %arg6[%c3_83, %c0_84, %c0_85] : memref<9x1x256xf32, #tpu.memory_space<vmem>>, vector<1x1x256xf32>
    %114 = vector.shape_cast %113 : vector<1x1x256xf32> to vector<1x256xf32>
    %115 = vector.broadcast %114 : vector<1x256xf32> to vector<8x256xf32>
    %116 = arith.mulf %112, %115 : vector<8x256xf32>
    %c3_86 = arith.constant 3 : index
    %c0_87 = arith.constant 0 : index
    %c0_88 = arith.constant 0 : index
    %117 = vector.load %arg4[%c3_86, %c0_87, %c0_88] : memref<9x8x8xf32, #tpu.memory_space<vmem>>, vector<1x8x8xf32>
    %118 = vector.shape_cast %117 : vector<1x8x8xf32> to vector<8x8xf32>
    %cst_89 = arith.constant dense<0.000000e+00> : vector<8x256xf32>
    %119 = tpu.matmul %118, %116, %cst_89 {dimension_numbers = #tpu.dot_dimension_numbers<[1], [0], [0], [1], [0, 0, 1, 1], [], []>} : vector<8x8xf32>, vector<8x256xf32>, vector<8x256xf32> -> vector<8x256xf32>
    %120 = arith.addf %111, %119 : vector<8x256xf32>
    %c4_90 = arith.constant 4 : index
    %c0_91 = arith.constant 0 : index
    %c0_92 = arith.constant 0 : index
    %121 = vector.load %arg4[%c4_90, %c0_91, %c0_92] : memref<9x8x8xf32, #tpu.memory_space<vmem>>, vector<1x8x8xf32>
    %122 = vector.shape_cast %121 : vector<1x8x8xf32> to vector<8x8xf32>
    %cst_93 = arith.constant dense<0.000000e+00> : vector<8x256xf32>
    %123 = tpu.matmul %122, %83, %cst_93 {dimension_numbers = #tpu.dot_dimension_numbers<[1], [0], [0], [1], [0, 0, 1, 1], [], []>} : vector<8x8xf32>, vector<8x256xf32>, vector<8x256xf32> -> vector<8x256xf32>
    %124 = arith.addf %120, %123 : vector<8x256xf32>
    %c255_i32_94 = arith.constant 255 : i32
    %125 = tpu.dynamic_rotate %83 by %c255_i32_94 dim 1 : vector<8x256xf32>, i32 -> vector<8x256xf32>
    %c5_95 = arith.constant 5 : index
    %c0_96 = arith.constant 0 : index
    %c0_97 = arith.constant 0 : index
    %126 = vector.load %arg6[%c5_95, %c0_96, %c0_97] : memref<9x1x256xf32, #tpu.memory_space<vmem>>, vector<1x1x256xf32>
    %127 = vector.shape_cast %126 : vector<1x1x256xf32> to vector<1x256xf32>
    %128 = vector.broadcast %127 : vector<1x256xf32> to vector<8x256xf32>
    %129 = arith.mulf %125, %128 : vector<8x256xf32>
    %c5_98 = arith.constant 5 : index
    %c0_99 = arith.constant 0 : index
    %c0_100 = arith.constant 0 : index
    %130 = vector.load %arg4[%c5_98, %c0_99, %c0_100] : memref<9x8x8xf32, #tpu.memory_space<vmem>>, vector<1x8x8xf32>
    %131 = vector.shape_cast %130 : vector<1x8x8xf32> to vector<8x8xf32>
    %cst_101 = arith.constant dense<0.000000e+00> : vector<8x256xf32>
    %132 = tpu.matmul %131, %129, %cst_101 {dimension_numbers = #tpu.dot_dimension_numbers<[1], [0], [0], [1], [0, 0, 1, 1], [], []>} : vector<8x8xf32>, vector<8x256xf32>, vector<8x256xf32> -> vector<8x256xf32>
    %133 = arith.addf %124, %132 : vector<8x256xf32>
    %c241_i32_102 = arith.constant 241 : i32
    %134 = tpu.dynamic_rotate %83 by %c241_i32_102 dim 1 : vector<8x256xf32>, i32 -> vector<8x256xf32>
    %c6_103 = arith.constant 6 : index
    %c0_104 = arith.constant 0 : index
    %c0_105 = arith.constant 0 : index
    %135 = vector.load %arg6[%c6_103, %c0_104, %c0_105] : memref<9x1x256xf32, #tpu.memory_space<vmem>>, vector<1x1x256xf32>
    %136 = vector.shape_cast %135 : vector<1x1x256xf32> to vector<1x256xf32>
    %137 = vector.broadcast %136 : vector<1x256xf32> to vector<8x256xf32>
    %138 = arith.mulf %134, %137 : vector<8x256xf32>
    %c6_106 = arith.constant 6 : index
    %c0_107 = arith.constant 0 : index
    %c0_108 = arith.constant 0 : index
    %139 = vector.load %arg4[%c6_106, %c0_107, %c0_108] : memref<9x8x8xf32, #tpu.memory_space<vmem>>, vector<1x8x8xf32>
    %140 = vector.shape_cast %139 : vector<1x8x8xf32> to vector<8x8xf32>
    %cst_109 = arith.constant dense<0.000000e+00> : vector<8x256xf32>
    %141 = tpu.matmul %140, %138, %cst_109 {dimension_numbers = #tpu.dot_dimension_numbers<[1], [0], [0], [1], [0, 0, 1, 1], [], []>} : vector<8x8xf32>, vector<8x256xf32>, vector<8x256xf32> -> vector<8x256xf32>
    %142 = arith.addf %133, %141 : vector<8x256xf32>
    %c240_i32_110 = arith.constant 240 : i32
    %143 = tpu.dynamic_rotate %83 by %c240_i32_110 dim 1 : vector<8x256xf32>, i32 -> vector<8x256xf32>
    %c7_111 = arith.constant 7 : index
    %c0_112 = arith.constant 0 : index
    %c0_113 = arith.constant 0 : index
    %144 = vector.load %arg6[%c7_111, %c0_112, %c0_113] : memref<9x1x256xf32, #tpu.memory_space<vmem>>, vector<1x1x256xf32>
    %145 = vector.shape_cast %144 : vector<1x1x256xf32> to vector<1x256xf32>
    %146 = vector.broadcast %145 : vector<1x256xf32> to vector<8x256xf32>
    %147 = arith.mulf %143, %146 : vector<8x256xf32>
    %c7_114 = arith.constant 7 : index
    %c0_115 = arith.constant 0 : index
    %c0_116 = arith.constant 0 : index
    %148 = vector.load %arg4[%c7_114, %c0_115, %c0_116] : memref<9x8x8xf32, #tpu.memory_space<vmem>>, vector<1x8x8xf32>
    %149 = vector.shape_cast %148 : vector<1x8x8xf32> to vector<8x8xf32>
    %cst_117 = arith.constant dense<0.000000e+00> : vector<8x256xf32>
    %150 = tpu.matmul %149, %147, %cst_117 {dimension_numbers = #tpu.dot_dimension_numbers<[1], [0], [0], [1], [0, 0, 1, 1], [], []>} : vector<8x8xf32>, vector<8x256xf32>, vector<8x256xf32> -> vector<8x256xf32>
    %151 = arith.addf %142, %150 : vector<8x256xf32>
    %c239_i32_118 = arith.constant 239 : i32
    %152 = tpu.dynamic_rotate %83 by %c239_i32_118 dim 1 : vector<8x256xf32>, i32 -> vector<8x256xf32>
    %c8_119 = arith.constant 8 : index
    %c0_120 = arith.constant 0 : index
    %c0_121 = arith.constant 0 : index
    %153 = vector.load %arg6[%c8_119, %c0_120, %c0_121] : memref<9x1x256xf32, #tpu.memory_space<vmem>>, vector<1x1x256xf32>
    %154 = vector.shape_cast %153 : vector<1x1x256xf32> to vector<1x256xf32>
    %155 = vector.broadcast %154 : vector<1x256xf32> to vector<8x256xf32>
    %156 = arith.mulf %152, %155 : vector<8x256xf32>
    %c8_122 = arith.constant 8 : index
    %c0_123 = arith.constant 0 : index
    %c0_124 = arith.constant 0 : index
    %157 = vector.load %arg4[%c8_122, %c0_123, %c0_124] : memref<9x8x8xf32, #tpu.memory_space<vmem>>, vector<1x8x8xf32>
    %158 = vector.shape_cast %157 : vector<1x8x8xf32> to vector<8x8xf32>
    %cst_125 = arith.constant dense<0.000000e+00> : vector<8x256xf32>
    %159 = tpu.matmul %158, %156, %cst_125 {dimension_numbers = #tpu.dot_dimension_numbers<[1], [0], [0], [1], [0, 0, 1, 1], [], []>} : vector<8x8xf32>, vector<8x256xf32>, vector<8x256xf32> -> vector<8x256xf32>
    %160 = arith.addf %151, %159 : vector<8x256xf32>
    %c0_126 = arith.constant 0 : index
    %c0_127 = arith.constant 0 : index
    %161 = vector.load %arg5[%c0_126, %c0_127] : memref<8x1xf32, #tpu.memory_space<vmem>>, vector<8x1xf32>
    %162 = vector.broadcast %161 : vector<8x1xf32> to vector<8x256xf32>
    %163 = arith.addf %160, %162 : vector<8x256xf32>
    %cst_128 = arith.constant 0.000000e+00 : f32
    %164 = vector.broadcast %cst_128 : f32 to vector<8x256xf32>
    %165 = arith.maximumf %163, %164 : vector<8x256xf32>
    %c0_129 = arith.constant 0 : index
    %c0_130 = arith.constant 0 : index
    %c0_131 = arith.constant 0 : index
    %166 = vector.load %arg7[%c0_129, %c0_130, %c0_131] : memref<1x8x256xf32, #tpu.memory_space<vmem>>, vector<1x8x256xf32>
    %167 = vector.shape_cast %166 : vector<1x8x256xf32> to vector<8x256xf32>
    %168 = vector.shape_cast %165 : vector<8x256xf32> to vector<1x8x256xf32>
    tpu.vector_store %arg7[%c0_129, %c0_130, %c0_131], %168 {strides = array<i32>} : memref<1x8x256xf32, #tpu.memory_space<vmem>>, vector<1x8x256xf32>,
    return
  }
  func.func @transform_0(%arg0: i32) -> (i32, i32, i32) {
    %c0_i32 = arith.constant 0 : i32
    %c0_i32_0 = arith.constant 0 : i32
    %c0_i32_1 = arith.constant 0 : i32
    return %arg0, %c0_i32, %c0_i32_0 : i32, i32, i32
  }
  func.func @transform_1(%arg0: i32) -> (i32, i32, i32) {
    %c0_i32 = arith.constant 0 : i32
    %c0_i32_0 = arith.constant 0 : i32
    %c0_i32_1 = arith.constant 0 : i32
    %c0_i32_2 = arith.constant 0 : i32
    return %c0_i32, %c0_i32_0, %c0_i32_1 : i32, i32, i32
  }
  func.func @transform_2(%arg0: i32) -> (i32, i32) {
    %c0_i32 = arith.constant 0 : i32
    %c0_i32_0 = arith.constant 0 : i32
    %c0_i32_1 = arith.constant 0 : i32
    return %c0_i32, %c0_i32_0 : i32, i32
  }
  func.func @transform_3(%arg0: i32) -> (i32, i32, i32) {
    %c0_i32 = arith.constant 0 : i32
    %c0_i32_0 = arith.constant 0 : i32
    %c0_i32_1 = arith.constant 0 : i32
    %c0_i32_2 = arith.constant 0 : i32
    return %c0_i32, %c0_i32_0, %c0_i32_1 : i32, i32, i32
  }
  func.func @transform_4(%arg0: i32) -> (i32, i32) {
    %c0_i32 = arith.constant 0 : i32
    %c0_i32_0 = arith.constant 0 : i32
    %c0_i32_1 = arith.constant 0 : i32
    return %c0_i32, %c0_i32_0 : i32, i32
  }
  func.func @transform_5(%arg0: i32) -> (i32, i32, i32) {
    %c0_i32 = arith.constant 0 : i32
    %c0_i32_0 = arith.constant 0 : i32
    %c0_i32_1 = arith.constant 0 : i32
    %c0_i32_2 = arith.constant 0 : i32
    return %c0_i32, %c0_i32_0, %c0_i32_1 : i32, i32, i32
  }
  func.func @transform_6(%arg0: i32) -> (i32, i32, i32) {
    %c0_i32 = arith.constant 0 : i32
    %c0_i32_0 = arith.constant 0 : i32
    %c0_i32_1 = arith.constant 0 : i32
    return %arg0, %c0_i32, %c0_i32_0 : i32, i32, i32
  }
}

</mosaic_0001>

<bundles_post_ra>
// kernel: double_conv.1
= control target key start
LH: loop header
LB: loop body
LE: loop exit
PB: predicated region body
PF: predicated region fallthrough
CT: control target
= control target key end

     0   :  { %s2200_s21 = smov 0   ;;  %s2584_s0 = inlined_call_operand.vmem [shape: f32[2,4,256], index: 0, kind: input, shape index: {}]   ;;  %s2585_s1 = inlined_call_operand.vmem [shape: f32[9,8,4], index: 1, kind: input, shape index: {}]   ;;  %s2586_s2 = inlined_call_operand.vmem [shape: f32[8,1], index: 2, kind: input, shape index: {}]   ;;  %s2587_s3 = inlined_call_operand.vmem [shape: f32[9,8,8], index: 3, kind: input, shape index: {}]   ;;  %s2588_s4 = inlined_call_operand.vmem [shape: f32[8,1], index: 4, kind: input, shape index: {}]   ;;  %s2589_s5 = inlined_call_operand.vmem [shape: f32[9,1,256], index: 5, kind: input, shape index: {}]   ;;  %s2590_s6 = inlined_call_operand.vmem [shape: f32[2,8,256], index: 6, kind: output, shape index: {}]  }
   0x1 LB: > { %s2023_s22 = sadd.s32 4294967295, %s2153_s21   ;;  %p2027_p0 = scmp.ge.s32.totalorder %s2153_s21, 1  ;;  %s2153_s21 = sphi %s2200_s21, %s16_s21  }
   0x2   : > { %p212_p1 = scmp.lt.s32.totalorder %s2153_s21, 3 }
   0x4   : > { %p213_p2 = pnand %p2027_p0, %p212_p1 }
   0x5   : > { %p242_p3 = scmp.lt.s32.totalorder (!%p213_p2), %s2023_s22, 1  ;;  %v2155_v0 = vmov (!%p213_p2), 0.0   ;;  %s2156_s27 = smov (!%p213_p2), 17   ;;  %v1184_v3 = vld [vmem:[%s2586_s2] sm:$0xff] (!%p213_p2)  ;;  %v2164_v4 = vmov (!%p213_p2), 0   ;;  %v260_v5 = vlaneseq (!%p213_p2)  ;;  %vm308_vm2 = vcmask (!%p213_p2), 1043456  }
   0x6   : > { %216 = sbr.rel (%p213_p2) target bundleno = 827 (0x33b), region = 44  ;;  %379 = vmatprep.mubr.f32.mxu0 (!%p213_p2), %v2155_v0  ;;  %1281 = vmatprep.mubr.f32.mxu1 (!%p213_p2), %v2155_v0  ;;  %s2157_s28 = smov (!%p213_p2), 16   ;;  %v265_v10 = vld [vmem:[%s2589_s5] sm:$0x3] (!%p213_p2)  ;;  %v2032_v11 = vld [vmem:[%s2589_s5 + $0x2] sm:$0x3] (!%p213_p2) }
   0x7   : > { %s2158_s29 = smov (!%p213_p2), 15   ;;  %s2159_s30 = smov (!%p213_p2), 1   ;;  %2145 = vset.pattern.permute.xlu0 (!%p213_p2), %v2164_v4  ;;  %v268_v6 = vshrl.u32 (!%p213_p2), %v260_v5, 7  ;;  %v2257_v7 = vand.u32 (!%p213_p2), 127, %v260_v5  ;;  %v2040_v18 = vld [vmem:[%s2589_s5 + $0x4] sm:$0x3] (!%p213_p2) }
   0x8   : > { %s2160_s7 = smov (!%p213_p2), 127   ;;  %s2161_s8 = smov (!%p213_p2), 113   ;;  %v2033_v30 = vld [vmem:[%s2585_s1 + $0x8] sm:$0xff] (!%p213_p2)  ;;  %vm304_vm4 = vcmask (!%p213_p2), 31744   ;;  %v2045_v34 = vld [vmem:[%s2589_s5 + $0x6] sm:$0x3] (!%p213_p2) }
   0x9   : > { %s2162_s9 = smov (!%p213_p2), 112   ;;  %s2163_s10 = smov (!%p213_p2), 111   ;;  %v2259_v8 = vsub.s32 (!%p213_p2), 0, %v268_v6  ;;  %v2261_v9 = vsub.s32 (!%p213_p2), 1, %v268_v6  ;;  %vm262_vm0 = vcmp.lt.s32.totalorder (!%p213_p2), %v2257_v7, 17  ;;  %vm284_vm1 = vcmp.lt.s32.totalorder (!%p213_p2), %v2257_v7, 16 }
   0xa   : > { %vm470_vm3 = vcmp.lt.s32.totalorder (!%p213_p2), %v2257_v7, 15  ;;  %vm576_vm5 = vcmp.lt.s32.totalorder (!%p213_p2), %v2257_v7, 1  ;;  %v279_v43 = vld [vmem:[%s2585_s1] sm:$0xff] (!%p213_p2)  ;;  %v2041_v48 = vld [vmem:[%s2585_s1 + $0x10] sm:$0xff] (!%p213_p2)  ;;  %v2054_v49 = vld [vmem:[%s2589_s5 + $0xa] sm:$0x3] (!%p213_p2) }
   0xb   : > { %v2271_v14 = vrot.slane (!%p213_p2), %v265_v10, %v2261_v9  ;;  %v2275_v15 = vrot.slane (!%p213_p2), %v2032_v11, %v2259_v8  ;;  %v2278_v16 = vrot.slane (!%p213_p2), %v2032_v11, %v2261_v9  ;;  %v2281_v17 = vrot.slane (!%p213_p2), %v265_v10, %v2259_v8  ;;  %v2046_v54 = vld [vmem:[%s2585_s1 + $0x18] sm:$0xff] (!%p213_p2)  ;;  %v2059_v56 = vld [vmem:[%s2589_s5 + $0xc] sm:$0x3] (!%p213_p2) }
   0xc   : > { %v2299_v28 = vrot.slane (!%p213_p2), %v2040_v18, %v2261_v9  ;;  %v2318_v36 = vrot.slane (!%p213_p2), %v2040_v18, %v2259_v8  ;;  %v2325_v39 = vrot.slane (!%p213_p2), %v2045_v34, %v2261_v9  ;;  %v2337_v45 = vrot.slane (!%p213_p2), %v2045_v34, %v2259_v8  ;;  %v2055_v18 = vld [vmem:[%s2585_s1 + $0x28] sm:$0xff] (!%p213_p2) }
   0xd   : > { %s2592_s22 = smov (!%p242_p3, %s2023_s22), 1  ;;  %vm764_vm6 = vcmp.lt.s32.totalorder %v2257_v7, 127  ;;  %v2357_v52 = vrot.slane %v2054_v49, %v2261_v9  ;;  %vm870_vm7 = vcmp.lt.s32.totalorder %v2257_v7, 113  ;;  %v2373_v59 = vrot.slane %v2054_v49, %v2259_v8 }
   0xe   : > { %s2093_s23 = sshll.u32 %s2592_s22, 3  ;;  %v2380_v61 = vrot.slane %v2059_v56, %v2261_v9  ;;  %vm976_vm8 = vcmp.lt.s32.totalorder %v2257_v7, 112  ;;  %v2396_v6 = vrot.slane %v2059_v56, %v2259_v8  ;;  %vm1082_vm9 = vcmp.lt.s32.totalorder %v2257_v7, 111  ;;  %s2094_s17 = sshll.u32 %s2592_s22, 4 }
   0xf   : > { %s246_s26 = scalar_lea.vmem %s2584_s0, %s2093_s23  ;;  %vm1213_vm10 = vcmask 64512  }
  0x10   : > { %v2216_v1 = vld [vmem:[%s246_s26] sm:$0xff] }
  0x11   : > { %256 = vrot.lane.b32.xlu1 %v2216_v1, %s2156_s27  ;;  %280 = vrot.lane.b32.xlu0 %v2216_v1, %s2157_s28  ;;  %v2224_v2 = vcombine.high %v2216_v1, %v2216_v1 }
  0x15   : > { %258 = vrot.lane.b32.xlu1 %v2224_v2, %s2156_s27  ;;  %282 = vrot.lane.b32.xlu0 %v2224_v2, %s2157_s28 }
  0x19   : > { %468 = vrot.lane.b32.xlu1 %v2224_v2, %s2158_s29  ;;  %466 = vrot.lane.b32.xlu0 %v2216_v1, %s2158_s29 }
  0x1d   : > { %574 = vrot.lane.b32.xlu1 %v2224_v2, %s2159_s30  ;;  %572 = vrot.lane.b32.xlu0 %v2216_v1, %s2159_s30 }
  0x21   : > { %762 = vrot.lane.b32.xlu1 %v2224_v2, %s2160_s7  ;;  %760 = vrot.lane.b32.xlu0 %v2216_v1, %s2160_s7 }
  0x25   : > { %868 = vrot.lane.b32.xlu1 %v2224_v2, %s2161_s8  ;;  %866 = vrot.lane.b32.xlu0 %v2216_v1, %s2161_s8 }
  0x29   : > { %974 = vrot.lane.b32.xlu1 %v2224_v2, %s2162_s9  ;;  %972 = vrot.lane.b32.xlu0 %v2216_v1, %s2162_s9 }
  0x2d   : > { %1080 = vrot.lane.b32.xlu1 %v2224_v2, %s2163_s10  ;;  %1078 = vrot.lane.b32.xlu0 %v2216_v1, %s2163_s10 }
  0x31   : > { %1187 = vperm.xlu0 %2145, %v1184_v3   ;;  %v2064_v3 = vld [vmem:[%s2589_s5 + $0xe] sm:$0x3] }
  0x32   : > { %v2403_v11 = vrot.slane %v2064_v3, %v2261_v9 }
  0x83   : > { %v257_v12 = vpop.permute.xlu1 %256  ;;  %v281_v13 = vpop.permute.xlu0 %280 }
  0x87   : > { %v259_v19 = vpop.permute.xlu1 %258  ;;  %v283_v20 = vpop.permute.xlu0 %282 }
  0x88   : > { %v263_v21 = vsel %vm262_vm0, %v257_v12, %v259_v19  ;;  %v264_v22 = vsel %vm262_vm0, %v259_v19, %v257_v12  ;;  %v285_v23 = vsel %vm284_vm1, %v281_v13, %v283_v20  ;;  %v286_v24 = vsel %vm284_vm1, %v283_v20, %v281_v13  ;;  %v2069_v20 = vld [vmem:[%s2589_s5 + $0x10] sm:$0x3] }
  0x89   : > { %v278_v25 = vmul.f32 %v2271_v14, %v263_v21  ;;  %v300_v26 = vmul.f32 %v2275_v15, %v286_v24  ;;  %v301_v27 = vmul.f32 %v2278_v16, %v285_v23  ;;  %v277_v29 = vmul.f32 %v2281_v17, %v264_v22 }
  0x8a   : > { %v2419_v23 = vrot.slane %v2064_v3, %v2259_v8 }
  0x8b   : > { %2034 = vmatprep.subr.msk.mxu0 %vm308_vm2, %v301_v27  ;;  %v469_v31 = vpop.permute.xlu1 %468  ;;  %v467_v32 = vpop.permute.xlu0 %466 }
  0x8c   : > { %2035 = vmatpush1.msk.msra.mxu0 %vm308_vm2, %v300_v26  ;;  %v471_v33 = vsel %vm470_vm3, %v467_v32, %v469_v31  ;;  %v472_v37 = vsel %vm470_vm3, %v469_v31, %v467_v32  ;;  %v2438_v31 = vrot.slane %v2069_v20, %v2259_v8  ;;  %v2070_v8 = vld [vmem:[%s2585_s1 + $0x40] sm:$0xff] }
  0x8d   : > { %2036 = vmatmul.mubr.msk.f32.vlgmr.msra.gmra.mrb[0].mxu0 %vm304_vm4, %v2033_v30  ;;  %2037 = vmatprep.subr.msk.mxu0 %vm308_vm2, %v278_v25  ;;  %v487_v35 = vmul.f32 %v2299_v28, %v471_v33  ;;  %v486_v42 = vmul.f32 %v2318_v36, %v472_v37  ;;  %v2426_v25 = vrot.slane %v2069_v20, %v2261_v9  ;;  %v2065_v33 = vld [vmem:[%s2585_s1 + $0x38] sm:$0xff] }
  0x8e   : > { %2038 = vmatpush1.msk.msra.mxu0 %vm308_vm2, %v277_v29  ;;  %459 = vmatprep.mubr.f32.mxu0 %v2155_v0  ;;  %v2060_v29 = vld [vmem:[%s2585_s1 + $0x30] sm:$0xff] }
  0x8f   : > { %2042 = vmatprep.subr.msk.mxu0 %vm308_vm2, %v487_v35  ;;  %v575_v38 = vpop.permute.xlu1 %574  ;;  %v573_v40 = vpop.permute.xlu0 %572 }
  0x90   : > { %v577_v41 = vsel %vm576_vm5, %v573_v40, %v575_v38  ;;  %v578_v46 = vsel %vm576_vm5, %v575_v38, %v573_v40 }
  0x91   : > { %v593_v44 = vmul.f32 %v2325_v39, %v577_v41  ;;  %v592_v47 = vmul.f32 %v2337_v45, %v578_v46 }
  0x93   : > { %v763_v50 = vpop.permute.xlu1 %762  ;;  %v761_v51 = vpop.permute.xlu0 %760 }
  0x94   : > { %v766_v53 = vsel %vm764_vm6, %v763_v50, %v761_v51  ;;  %v765_v60 = vsel %vm764_vm6, %v761_v51, %v763_v50 }
  0x95   : > { %2039 = vmatmul.mubr.msk.f32.vlgmr.msra.gmra.mrb[0].mxu0 %vm304_vm4, %v279_v43  ;;  %v781_v55 = vmul.f32 %v2357_v52, %v766_v53  ;;  %v780_v63 = vmul.f32 %v2373_v59, %v765_v60  ;;  %v1956_v43 = vld [vmem:[%s2588_s4] sm:$0xff]  ;;  %v2074_v53 = vld [vmem:[%s2587_s3 + $0x8] sm:$0xff] }
  0x96   : > { %2043 = vmatpush1.msk.msra.mxu0 %vm308_vm2, %v486_v42  ;;  %563 = vmatprep.mubr.f32.mxu0 %v2155_v0 }
  0x97   : > { %2047 = vmatprep.subr.msk.mxu0 %vm308_vm2, %v593_v44  ;;  %v869_v57 = vpop.permute.xlu1 %868  ;;  %v867_v58 = vpop.permute.xlu0 %866 }
  0x98   : > { %v872_v62 = vsel %vm870_vm7, %v869_v57, %v867_v58  ;;  %v871_v10 = vsel %vm870_vm7, %v867_v58, %v869_v57 }
  0x99   : > { %v886_v13 = vmul.f32 %v2396_v6, %v871_v10 }
  0x9b   : > { %v975_v4 = vpop.permute.xlu1 %974  ;;  %v973_v5 = vpop.permute.xlu0 %972 }
  0x9c   : > { %v978_v12 = vsel %vm976_vm8, %v975_v4, %v973_v5  ;;  %v977_v24 = vsel %vm976_vm8, %v973_v5, %v975_v4  ;;  %v2077_v5 = vld [vmem:[%s2587_s3 + $0x10] sm:$0xff] }
  0x9d   : > { %2044 = vmatmul.mubr.msk.f32.vlgmr.msra.gmra.mrb[0].mxu0 %vm304_vm4, %v2041_v48  ;;  %v993_v19 = vmul.f32 %v2403_v11, %v978_v12  ;;  %v992_v27 = vmul.f32 %v2419_v23, %v977_v24 }
  0x9e   : > { %2048 = vmatpush1.msk.msra.mxu0 %vm308_vm2, %v592_v47  ;;  %669 = vmatprep.mubr.f32.mxu0 %v2155_v0 }
  0x9f   : > { %2051 = vmatprep.subr.msk.mxu0 %vm308_vm2, %v2224_v2  ;;  %v887_v2 = vmul.f32 %v2380_v61, %v872_v62  ;;  %v1081_v21 = vpop.permute.xlu1 %1080  ;;  %v1079_v22 = vpop.permute.xlu0 %1078 }
  0xa0   : > { %v1084_v26 = vsel %vm1082_vm9, %v1081_v21, %v1079_v22  ;;  %v1083_v9 = vsel %vm1082_vm9, %v1079_v22, %v1081_v21  ;;  %v2081_v22 = vld [vmem:[%s2587_s3 + $0x20] sm:$0xff] }
  0xa1   : > { %v1099_v30 = vmul.f32 %v2426_v25, %v1084_v26  ;;  %v1098_v32 = vmul.f32 %v2438_v31, %v1083_v9 }
  0xa5   : > { %2049 = vmatmul.mubr.msk.f32.vlgmr.msra.gmra.mrb[0].mxu0 %vm304_vm4, %v2046_v54 }
  0xa6   : > { %2052 = vmatpush1.msk.msra.mxu0 %vm308_vm2, %v2216_v1  ;;  %751 = vmatprep.mubr.f32.mxu0 %v2155_v0  ;;  %v2050_v1 = vld [vmem:[%s2585_s1 + $0x20] sm:$0xff] }
  0xa7   : > { %2056 = vmatprep.subr.msk.mxu0 %vm308_vm2, %v781_v55 }
  0xad   : > { %2053 = vmatmul.mubr.msk.f32.vlgmr.msra.gmra.mrb[0].mxu0 %vm304_vm4, %v2050_v1 }
  0xae   : > { %2057 = vmatpush1.msk.msra.mxu0 %vm308_vm2, %v780_v63  ;;  %857 = vmatprep.mubr.f32.mxu0 %v2155_v0 }
  0xaf   : > { %2061 = vmatprep.subr.msk.mxu0 %vm308_vm2, %v887_v2 }
  0xb0   : > { %v1188_v34 = vpop.permute.xlu0 %1187 }
  0xb5   : > { %2058 = vmatmul.mubr.msk.f32.vlgmr.msra.gmra.mrb[0].mxu0 %vm304_vm4, %v2055_v18 }
  0xb6   : > { %2062 = vmatpush1.msk.msra.mxu0 %vm308_vm2, %v886_v13  ;;  %963 = vmatprep.mubr.f32.mxu0 %v2155_v0  ;;  %v2079_v13 = vld [vmem:[%s2587_s3 + $0x18] sm:$0xff] }
  0xb7   : > { %2066 = vmatprep.subr.msk.mxu0 %vm308_vm2, %v993_v19 }
  0xbd   : > { %2063 = vmatmul.mubr.msk.f32.vlgmr.msra.gmra.mrb[0].mxu0 %vm304_vm4, %v2060_v29 }
  0xbe   : > { %2067 = vmatpush1.msk.msra.mxu0 %vm308_vm2, %v992_v27  ;;  %1069 = vmatprep.mubr.f32.mxu0 %v2155_v0 }
  0xbf   : > { %2071 = vmatprep.subr.msk.mxu0 %vm308_vm2, %v1099_v30 }
  0xc5   : > { %2068 = vmatmul.mubr.msk.f32.vlgmr.msra.gmra.mrb[0].mxu0 %vm304_vm4, %v2065_v33 }
  0xc6   : > { %2072 = vmatpush1.msk.msra.mxu0 %vm308_vm2, %v1098_v32  ;;  %1175 = vmatprep.mubr.f32.mxu0 %v2155_v0 }
  0xcd   : > { %2073 = vmatmul.mubr.msk.f32.vlgmr.msra.gmra.mrb[0].mxu0 %vm304_vm4, %v2070_v8 }
 0x1a0   : > { %v1177_v35 = vpop.f32.mrb[0].mxu0 }
 0x1a1   : > { %v1190_v37 = vadd.f32 %v1188_v34, %v1177_v35  ;;  %v1179_v38 = vpop.f32.mrb[1].mxu0 }
 0x1a2   : > { %v1191_v41 = vadd.f32 %v1188_v34, %v1179_v38  ;;  %v2087_v38 = vld [vmem:[%s2587_s3 + $0x38] sm:$0xff] }
 0x1a3   : > { %v2455_v40 = vmax.f32 %v1190_v37, 0.0 }
 0x1a4   : > { %v1193_v42 = vmax.f32 %v1191_v41, 0.0 }
 0x1a5   : > { %1194 = vrot.lane.b32.xlu0 %v2455_v40, %s2156_s27  ;;  %1203 = vrot.lane.b32.xlu1 %v2455_v40, %s2157_s28 }
 0x1a9   : > { %1362 = vrot.lane.b32.xlu0 %v2455_v40, %s2158_s29  ;;  %1205 = vrot.lane.b32.xlu1 %v1193_v42, %s2157_s28  ;;  %s251_s28 = scalar_lea.vmem %s2590_s6, %s2094_s17 }
 0x1ad   : > { %1448 = vrot.lane.b32.xlu0 %v2455_v40, %s2159_s30  ;;  %1196 = vrot.lane.b32.xlu1 %v1193_v42, %s2156_s27 }
 0x1b1   : > { %1612 = vrot.lane.b32.xlu0 %v2455_v40, %s2160_s7  ;;  %1364 = vrot.lane.b32.xlu1 %v1193_v42, %s2158_s29 }
 0x1b5   : > { %1698 = vrot.lane.b32.xlu0 %v2455_v40, %s2161_s8  ;;  %1450 = vrot.lane.b32.xlu1 %v1193_v42, %s2159_s30 }
 0x1b9   : > { %1784 = vrot.lane.b32.xlu0 %v2455_v40, %s2162_s9  ;;  %1614 = vrot.lane.b32.xlu1 %v1193_v42, %s2160_s7 }
 0x1bd   : > { %1870 = vrot.lane.b32.xlu0 %v2455_v40, %s2163_s10  ;;  %1700 = vrot.lane.b32.xlu1 %v1193_v42, %s2161_s8 }
 0x1c1   : > { %1959 = vperm.xlu0 %2145, %v1956_v43   ;;  %1786 = vrot.lane.b32.xlu1 %v1193_v42, %s2162_s9 }
 0x1c5   : > { %1872 = vrot.lane.b32.xlu1 %v1193_v42, %s2163_s10 }
 0x217   : > { %v1204_v44 = vpop.permute.xlu1 %1203  ;;  %v1195_v46 = vpop.permute.xlu0 %1194 }
 0x21b   : > { %v1206_v47 = vpop.permute.xlu1 %1205  ;;  %v1363_v57 = vpop.permute.xlu0 %1362 }
 0x21c   : > { %v1208_v48 = vsel %vm284_vm1, %v1206_v47, %v1204_v44  ;;  %v1207_v49 = vsel %vm284_vm1, %v1204_v44, %v1206_v47 }
 0x21d   : > { %v1210_v50 = vmul.f32 %v1207_v49, %v2278_v16  ;;  %v1209_v51 = vmul.f32 %v1208_v48, %v2275_v15 }
 0x21f   : > { %1217 = vmatprep.subr.mxu1 %v1210_v50  ;;  %v1197_v54 = vpop.permute.xlu1 %1196 }
 0x220   : > { %v1198_v55 = vsel %vm262_vm0, %v1195_v46, %v1197_v54  ;;  %v1199_v56 = vsel %vm262_vm0, %v1197_v54, %v1195_v46  ;;  %1218 = vmatpush1.msra.mxu1 %v1209_v51 }
 0x221   : > { %v1200_v58 = vmul.f32 %v1199_v56, %v2281_v17  ;;  %v1201_v16 = vmul.f32 %v1198_v55, %v2271_v14  ;;  %2075 = vmatmul.mubr.msk.f32.vlgmr.msra.gmra.mrb[0].mxu1 %vm1213_vm10, %v2074_v53  ;;  %v1202_v17 = vld [vmem:[%s2587_s3] sm:$0xff]  ;;  %v1449_v14 = vpop.permute.xlu0 %1448 }
 0x222   : > { %1355 = vmatprep.mubr.f32.mxu1 %v2155_v0 }
 0x223   : > { %1291 = vmatprep.subr.mxu1 %v1201_v16  ;;  %v1365_v15 = vpop.permute.xlu1 %1364 }
 0x224   : > { %v1366_v60 = vsel %vm470_vm3, %v1363_v57, %v1365_v15  ;;  %1292 = vmatpush1.msra.mxu1 %v1200_v58  ;;  %v1367_v62 = vsel %vm470_vm3, %v1365_v15, %v1363_v57 }
 0x225   : > { %v1369_v63 = vmul.f32 %v1366_v60, %v2299_v28  ;;  %v1368_v2 = vmul.f32 %v1367_v62, %v2318_v36  ;;  %v1613_v10 = vpop.permute.xlu0 %1612 }
 0x227   : > { %1375 = vmatprep.subr.mxu1 %v1369_v63  ;;  %v1451_v1 = vpop.permute.xlu1 %1450 }
 0x228   : > { %v1452_v3 = vsel %vm576_vm5, %v1449_v14, %v1451_v1  ;;  %v1453_v28 = vsel %vm576_vm5, %v1451_v1, %v1449_v14 }
 0x229   : > { %v1455_v4 = vmul.f32 %v1452_v3, %v2325_v39  ;;  %2076 = vmatmul.mubr.msk.f32.vlgmr.msra.gmra.mrb[0].mxu1 %vm1213_vm10, %v1202_v17  ;;  %v1454_v36 = vmul.f32 %v1453_v28, %v2337_v45  ;;  %v1699_v19 = vpop.permute.xlu0 %1698 }
 0x22a   : > { %1376 = vmatpush1.msra.mxu1 %v1368_v2  ;;  %1439 = vmatprep.mubr.f32.mxu1 %v2155_v0 }
 0x22b   : > { %1461 = vmatprep.subr.mxu1 %v1455_v4  ;;  %v1615_v39 = vpop.permute.xlu1 %1614 }
 0x22c   : > { %v1617_v12 = vsel %vm764_vm6, %v1615_v39, %v1613_v10  ;;  %v1616_v20 = vsel %vm764_vm6, %v1613_v10, %v1615_v39 }
 0x22d   : > { %v1619_v18 = vmul.f32 %v1617_v12, %v2357_v52  ;;  %v1618_v52 = vmul.f32 %v1616_v20, %v2373_v59  ;;  %v1785_v27 = vpop.permute.xlu0 %1784  ;;  %v2083_v59 = vld [vmem:[%s2587_s3 + $0x28] sm:$0xff] }
 0x22f   : > { %v1701_v45 = vpop.permute.xlu1 %1700 }
 0x230   : > { %v1703_v21 = vsel %vm870_vm7, %v1701_v45, %v1699_v19  ;;  %v1702_v29 = vsel %vm870_vm7, %v1699_v19, %v1701_v45 }
 0x231   : > { %2078 = vmatmul.mubr.msk.f32.vlgmr.msra.gmra.mrb[0].mxu1 %vm1213_vm10, %v2077_v5  ;;  %v1705_v24 = vmul.f32 %v1703_v21, %v2380_v61  ;;  %v1704_v61 = vmul.f32 %v1702_v29, %v2396_v6  ;;  %v1871_v33 = vpop.permute.xlu0 %1870  ;;  %v2085_v6 = vld [vmem:[%s2587_s3 + $0x30] sm:$0xff] }
 0x232   : > { %1462 = vmatpush1.msra.mxu1 %v1454_v36  ;;  %1525 = vmatprep.mubr.f32.mxu1 %v2155_v0 }
 0x233   : > { %1539 = vmatprep.subr.mxu1 %v1193_v42  ;;  %v1787_v26 = vpop.permute.xlu1 %1786 }
 0x234   : > { %v1789_v30 = vsel %vm976_vm8, %v1787_v26, %v1785_v27  ;;  %v1788_v8 = vsel %vm976_vm8, %v1785_v27, %v1787_v26 }
 0x235   : > { %v1791_v9 = vmul.f32 %v1789_v30, %v2403_v11  ;;  %v1790_v11 = vmul.f32 %v1788_v8, %v2419_v23  ;;  %v2089_v23 = vld [vmem:[%s2587_s3 + $0x40] sm:$0xff] }
 0x237   : > { %v1873_v32 = vpop.permute.xlu1 %1872 }
 0x238   : > { %v1875_v34 = vsel %vm1082_vm9, %v1873_v32, %v1871_v33  ;;  %v1874_v37 = vsel %vm1082_vm9, %v1871_v33, %v1873_v32 }
 0x239   : > { %2080 = vmatmul.mubr.msk.f32.vlgmr.msra.gmra.mrb[0].mxu1 %vm1213_vm10, %v2079_v13  ;;  %v1877_v35 = vmul.f32 %v1875_v34, %v2426_v25 }
 0x23a   : > { %1540 = vmatpush1.msra.mxu1 %v2455_v40  ;;  %1603 = vmatprep.mubr.f32.mxu1 %v2155_v0  ;;  %v1876_v40 = vmul.f32 %v1874_v37, %v2438_v31 }
 0x23b   : > { %1625 = vmatprep.subr.mxu1 %v1619_v18 }
 0x240   : > { %v1960_v7 = vpop.permute.xlu0 %1959 }
 0x241   : > { %2082 = vmatmul.mubr.msk.f32.vlgmr.msra.gmra.mrb[0].mxu1 %vm1213_vm10, %v2081_v22 }
 0x242   : > { %1626 = vmatpush1.msra.mxu1 %v1618_v52  ;;  %1689 = vmatprep.mubr.f32.mxu1 %v2155_v0 }
 0x243   : > { %1711 = vmatprep.subr.mxu1 %v1705_v24 }
 0x249   : > { %2084 = vmatmul.mubr.msk.f32.vlgmr.msra.gmra.mrb[0].mxu1 %vm1213_vm10, %v2083_v59 }
 0x24a   : > { %1712 = vmatpush1.msra.mxu1 %v1704_v61  ;;  %1775 = vmatprep.mubr.f32.mxu1 %v2155_v0 }
 0x24b   : > { %1797 = vmatprep.subr.mxu1 %v1791_v9 }
 0x251   : > { %2086 = vmatmul.mubr.msk.f32.vlgmr.msra.gmra.mrb[0].mxu1 %vm1213_vm10, %v2085_v6 }
 0x252   : > { %1798 = vmatpush1.msra.mxu1 %v1790_v11  ;;  %1861 = vmatprep.mubr.f32.mxu1 %v2155_v0 }
 0x253   : > { %1883 = vmatprep.subr.mxu1 %v1877_v35 }
 0x259   : > { %2088 = vmatmul.mubr.msk.f32.vlgmr.msra.gmra.mrb[0].mxu1 %vm1213_vm10, %v2087_v38 }
 0x25a   : > { %1884 = vmatpush1.msra.mxu1 %v1876_v40  ;;  %1947 = vmatprep.mubr.f32.mxu1 %v2155_v0 }
 0x261   : > { %2090 = vmatmul.mubr.msk.f32.vlgmr.msra.gmra.mrb[0].mxu1 %vm1213_vm10, %v2089_v23 }
 0x334   : > { %v1949_v25 = vpop.f32.mrb[0].mxu1 }
 0x335   : > { %v1962_v41 = vadd.f32 %v1960_v7, %v1949_v25  ;;  %v1951_v42 = vpop.f32.mrb[1].mxu1 }
 0x336   : > { %v1963_v31 = vadd.f32 %v1960_v7, %v1951_v42 }
 0x337   : > { %v1964_v43 = vmax.f32 %v1962_v41, 0.0 }
 0x338   : > { %v1965_v44 = vmax.f32 %v1963_v31, 0.0 }
 0x339   : > { %1966 = vst [vmem:[%s251_s28] sm:$0xff] %v1964_v43 }
 0x33a   : > { %1967 = vst [vmem:[%s251_s28 + $0x8] sm:$0xff] %v1965_v44 }
 0x33b PF: > { %s16_s21 = sadd.s32 1, %s2153_s21  }
 0x33c   : > { %p13_p4 = scmp.ge.s32.totalorder %s16_s21, 4  }
 0x33e   :  { %15 = sbr.rel (!%p13_p4) target bundleno = 1 (0x1), region = 97 }

</bundles_post_ra>
